<compile_context>
chip_gen: v7x
topology: tpu7x:2x2x1
jax: 0.10.0
libtpu: 0.0.40
codegen_flags: <defaults>
</compile_context>

<pallas_src>
import functools

import jax
import jax.numpy as jnp
from jax.experimental import pallas as pl
from jax.experimental.pallas import tpu as pltpu

# 48 MiB scoped VMEM: above the 16/32 MiB defaults, still under v7x's 64 MiB
# physical VMEM (v5e/v6e have 128 MiB, so this is safe everywhere).
_VMEM_LIMIT = 48 * 1024 * 1024


def _gelu_tanh(x):
    # "gelu_new" / tanh-approximate GELU (matches HF gelu_new activation).
    # TODO(synk): exact-erf GELU ("gelu") would need lax.erf; tanh approx used here.
    c = 0.7978845608028654  # sqrt(2/pi)
    return 0.5 * x * (1.0 + jnp.tanh(c * (x + 0.044715 * x * x * x)))


def _round_up(x, m):
    return (x + m - 1) // m * m


def _transform(x, w1, b1, g, be, eps):
    # dense -> gelu -> LayerNorm, all in f32 (bf16 MXU operands, f32 acc).
    h = jnp.dot(x, w1, preferred_element_type=jnp.float32) + b1
    h = _gelu_tanh(h)
    mean = jnp.mean(h, axis=-1, keepdims=True)
    var = jnp.mean(jnp.square(h - mean), axis=-1, keepdims=True)
    h = (h - mean) * jax.lax.rsqrt(var + eps)
    return h * g + be


def _fused_kernel(x_ref, w1_ref, b1_ref, g_ref, be_ref, w2_ref, b2_ref,
                  out_ref, h_scratch, *, eps):
    # Grid = (row_tiles, vocab_outer, vocab_inner); vocab_inner is innermost
    # ("arbitrary").  The transform only depends on the row tile, so compute
    # it once per (row tile, vocab_outer) into VMEM scratch and reuse it
    # across the inner vocab loop.
    @pl.when(pl.program_id(2) == 0)
    def _():
        h = _transform(x_ref[...], w1_ref[...], b1_ref[...],
                       g_ref[...], be_ref[...], eps)
        h_scratch[...] = h.astype(jnp.bfloat16)   # bf16 decoder LHS

    # Decoder projection for this (row tile, vocab tile): bf16 x bf16 -> f32.
    out_ref[...] = (jnp.dot(h_scratch[...], w2_ref[...],
                            preferred_element_type=jnp.float32)
                    + b2_ref[...]).astype(out_ref.dtype)


def _transform_kernel(x_ref, w1_ref, b1_ref, g_ref, be_ref, h_ref, *, eps):
    h = _transform(x_ref[...], w1_ref[...], b1_ref[...],
                   g_ref[...], be_ref[...], eps)
    h_ref[...] = h.astype(h_ref.dtype)


def _decoder_kernel(h_ref, w2_ref, b2_ref, out_ref):
    out_ref[...] = (jnp.dot(h_ref[...], w2_ref[...],
                            preferred_element_type=jnp.float32)
                    + b2_ref[...]).astype(out_ref.dtype)


def bert_lm_transform_head(x, w1, b1, gamma, beta, w2, b2, *,
                           eps=1e-12, tile_n=512, tile_v=2048,
                           out_dtype=jnp.float32, mode="auto"):
    """x: [N, H] f32; w1: [H, H]; w2: [H, V] (weights stored [in, out]).

    Returns logits [N, V] in `out_dtype`.  Matmuls use bf16 operands with f32
    accumulation (documented precision choice).
    """
    N, H = x.shape
    V = w2.shape[1]

    # Clamp tiles to the (padded) problem size, keeping alignment:
    # rows to a multiple of 16 (bf16 sublane packing), vocab to a multiple of 128.
    tile_n = min(tile_n, _round_up(N, 16))
    tile_v = min(tile_v, _round_up(V, 128))
    Np = _round_up(N, tile_n)
    Vp = _round_up(V, tile_v)

    if Np != N:
        x = jnp.pad(x, ((0, Np - N), (0, 0)))
    if Vp != V:
        w2 = jnp.pad(w2, ((0, 0), (0, Vp - V)))
        b2 = jnp.pad(b2, ((0, 0), (0, Vp - V)))

    # bf16 MXU operands; biases / LayerNorm params stay f32.
    x = x.astype(jnp.bfloat16)
    w1 = w1.astype(jnp.bfloat16)
    w2 = w2.astype(jnp.bfloat16)

    n_row = Np // tile_n
    n_vtile = Vp // tile_v

    if mode == "auto":
        # Single row tile -> fused (no HBM round trip for h, W2 streamed once
        # anyway).  Multiple row tiles -> two-pass (W2 streamed exactly once).
        mode = "fused" if n_row == 1 else "two_pass"

    compiler_params = lambda sem: pltpu.CompilerParams(
        dimension_semantics=sem, vmem_limit_bytes=_VMEM_LIMIT)

    if mode == "fused":
        # Split the vocab axis into (outer "parallel", inner "arbitrary") so
        # that on v7x both TensorCores get work even with a single row tile
        # (one cheap transform recompute per outer block).
        v_outer = 2 if (n_row == 1 and n_vtile % 2 == 0) else 1
        v_inner = n_vtile // v_outer

        out = pl.pallas_call(
            functools.partial(_fused_kernel, eps=eps),
            out_shape=jax.ShapeDtypeStruct((Np, Vp), out_dtype),
            grid_spec=pltpu.PrefetchScalarGridSpec(
                num_scalar_prefetch=0,
                grid=(n_row, v_outer, v_inner),
                in_specs=[
                    pl.BlockSpec((tile_n, H), lambda i, jo, ji: (i, 0)),   # x (bf16)
                    pl.BlockSpec((H, H),      lambda i, jo, ji: (0, 0)),   # dense W (bf16)
                    pl.BlockSpec((1, H),      lambda i, jo, ji: (0, 0)),   # dense b (f32)
                    pl.BlockSpec((1, H),      lambda i, jo, ji: (0, 0)),   # LN gamma (f32)
                    pl.BlockSpec((1, H),      lambda i, jo, ji: (0, 0)),   # LN beta (f32)
                    pl.BlockSpec((H, tile_v),
                                 lambda i, jo, ji: (0, jo * v_inner + ji)),  # decoder W (bf16)
                    pl.BlockSpec((1, tile_v),
                                 lambda i, jo, ji: (0, jo * v_inner + ji)),  # decoder b (f32)
                ],
                out_specs=pl.BlockSpec(
                    (tile_n, tile_v), lambda i, jo, ji: (i, jo * v_inner + ji)),
                # Post-LayerNorm activations, persistent across the vocab loop.
                scratch_shapes=[pltpu.VMEM((tile_n, H), jnp.bfloat16)],
            ),
            compiler_params=compiler_params(("parallel", "parallel", "arbitrary")),
        )(x, w1, b1, gamma, beta, w2, b2)

    elif mode == "two_pass":
        # Pass 1: dense + gelu + LayerNorm -> h [Np, H] bf16, one pass over x.
        h = pl.pallas_call(
            functools.partial(_transform_kernel, eps=eps),
            out_shape=jax.ShapeDtypeStruct((Np, H), jnp.bfloat16),
            grid_spec=pltpu.PrefetchScalarGridSpec(
                num_scalar_prefetch=0,
                grid=(n_row,),
                in_specs=[
                    pl.BlockSpec((tile_n, H), lambda i: (i, 0)),   # x (bf16)
                    pl.BlockSpec((H, H),      lambda i: (0, 0)),   # dense W (bf16)
                    pl.BlockSpec((1, H),      lambda i: (0, 0)),   # dense b (f32)
                    pl.BlockSpec((1, H),      lambda i: (0, 0)),   # LN gamma (f32)
                    pl.BlockSpec((1, H),      lambda i: (0, 0)),   # LN beta (f32)
                ],
                out_specs=pl.BlockSpec((tile_n, H), lambda i: (i, 0)),
            ),
            compiler_params=compiler_params(("parallel",)),
        )(x, w1, b1, gamma, beta)

        # Pass 2: decoder with the vocab axis OUTERMOST so each W2 tile is
        # DMA'd from HBM exactly once and reused across all row tiles; h is
        # the (much smaller) re-streamed operand.
        out = pl.pallas_call(
            _decoder_kernel,
            out_shape=jax.ShapeDtypeStruct((Np, Vp), out_dtype),
            grid_spec=pltpu.PrefetchScalarGridSpec(
                num_scalar_prefetch=0,
                grid=(n_vtile, n_row),
                in_specs=[
                    pl.BlockSpec((tile_n, H), lambda j, i: (i, 0)),   # h (bf16)
                    pl.BlockSpec((H, tile_v), lambda j, i: (0, j)),   # decoder W (bf16)
                    pl.BlockSpec((1, tile_v), lambda j, i: (0, j)),   # decoder b (f32)
                ],
                out_specs=pl.BlockSpec((tile_n, tile_v), lambda j, i: (i, j)),
            ),
            compiler_params=compiler_params(("parallel", "arbitrary")),
        )(h, w2, b2)

    else:
        raise ValueError(f"unknown mode: {mode!r}")

    if Np != N or Vp != V:
        out = out[:N, :V]
    return out


# ---------------------------------------------------------------------------
# References for the self-test.
# ---------------------------------------------------------------------------
def _reference_f32(x, w1, b1, gamma, beta, w2, b2, eps):
    h = x @ w1 + b1
    h = _gelu_tanh(h)
    mean = jnp.mean(h, axis=-1, keepdims=True)
    var = jnp.mean(jnp.square(h - mean), axis=-1, keepdims=True)
    h = (h - mean) * jax.lax.rsqrt(var + eps)
    h = h * gamma + beta
    return h @ w2 + b2


def _reference_bf16_ops(x, w1, b1, gamma, beta, w2, b2, eps):
    # Mirrors the kernel's numerics (bf16 MXU operands, f32 accumulation,
    # post-LayerNorm activations stored as bf16).
    h = jnp.dot(x.astype(jnp.bfloat16), w1.astype(jnp.bfloat16),
                preferred_element_type=jnp.float32) + b1
    h = _gelu_tanh(h)
    mean = jnp.mean(h, axis=-1, keepdims=True)
    var = jnp.mean(jnp.square(h - mean), axis=-1, keepdims=True)
    h = (h - mean) * jax.lax.rsqrt(var + eps)
    h = (h * gamma + beta).astype(jnp.bfloat16)
    return jnp.dot(h, w2.astype(jnp.bfloat16),
                   preferred_element_type=jnp.float32) + b2


if __name__ == "__main__":
    # Small shapes; N and V are deliberately NOT tile multiples to exercise
    # the padding path (real BERT vocab 30522 is not a multiple of 128 either).
    batch, seq, hidden, vocab = 2, 9, 128, 500
    eps = 1e-12

    key = jax.random.PRNGKey(0)
    k_x, k_w1, k_b1, k_w2 = jax.random.split(key, 4)

    hidden_states = jax.random.normal(k_x, (batch, seq, hidden), jnp.float32)

    # Deterministic parameter init (shapes from the module __init__),
    # weights stored as [in, out] (= transpose of nn.Linear's [out, in]).
    dense_w = jax.random.normal(k_w1, (hidden, hidden), jnp.float32) * 0.02
    dense_b = jax.random.normal(k_b1, (1, hidden), jnp.float32) * 0.02
    ln_gamma = jnp.ones((1, hidden), jnp.float32)
    ln_beta = jnp.zeros((1, hidden), jnp.float32)
    decoder_w = jax.random.normal(k_w2, (hidden, vocab), jnp.float32) * 0.02
    decoder_b = jnp.zeros((1, vocab), jnp.float32)  # decoder.bias = zeros(vocab)

    x2d = hidden_states.reshape(batch * seq, hidden)
    args = (x2d, dense_w, dense_b, ln_gamma, ln_beta, decoder_w, decoder_b)

    ref_bf = _reference_bf16_ops(*args, eps)
    ref_32 = _reference_f32(*args, eps)

    # 1) Defaults (auto -> fused; single-tile grid at these shapes).
    out1 = jax.block_until_ready(bert_lm_transform_head(*args, eps=eps))

    # 2) Fused path with small tiles: 1 row tile x 4 vocab tiles, exercising
    #    the (vocab_outer=2 "parallel", vocab_inner=2 "arbitrary") split and
    #    padding of both N and V.
    out2 = jax.block_until_ready(bert_lm_transform_head(
        *args, eps=eps, mode="fused", tile_n=32, tile_v=128))

    # 3) Two-pass path (transform once, decoder with vocab outermost) with
    #    multiple row and vocab tiles + padding.
    out3 = jax.block_until_ready(bert_lm_transform_head(
        *args, eps=eps, mode="two_pass", tile_n=16, tile_v=128))

    # 4) bf16 logits (halved output write traffic).
    out4 = jax.block_until_ready(bert_lm_transform_head(
        *args, eps=eps, out_dtype=jnp.bfloat16))

    for out in (out1, out2, out3):
        assert out.shape == (batch * seq, vocab)
        # Structural check vs a reference with matching bf16-operand numerics.
        assert jnp.allclose(out, ref_bf, atol=5e-3, rtol=5e-3), \
            float(jnp.max(jnp.abs(out - ref_bf)))
        # Semantic sanity check vs the full-f32 module reference.
        assert jnp.allclose(out, ref_32, atol=5e-2, rtol=5e-2), \
            float(jnp.max(jnp.abs(out - ref_32)))

    assert out4.shape == (batch * seq, vocab) and out4.dtype == jnp.bfloat16
    assert jnp.allclose(out4.astype(jnp.float32), ref_bf, atol=2e-2, rtol=2e-2), \
        float(jnp.max(jnp.abs(out4.astype(jnp.float32) - ref_bf)))

    print("KERNEL_OK")
</pallas_src>

<mosaic_0001>
module attributes {stable_mosaic.version = 11 : i64} {
  func.func @_fused_kernel(%arg0: i32, %arg1: i32, %arg2: i32, %arg3: memref<32x128xbf16, #tpu.memory_space<vmem>>, %arg4: memref<128x128xbf16, #tpu.memory_space<vmem>>, %arg5: memref<1x128xf32, #tpu.memory_space<vmem>>, %arg6: memref<1x128xf32, #tpu.memory_space<vmem>>, %arg7: memref<1x128xf32, #tpu.memory_space<vmem>>, %arg8: memref<128x512xbf16, #tpu.memory_space<vmem>>, %arg9: memref<1x512xf32, #tpu.memory_space<vmem>>, %arg10: memref<32x512xf32, #tpu.memory_space<vmem>>, %arg11: memref<32x128xbf16, #tpu.memory_space<vmem>>) attributes {dimension_semantics = [#tpu.dimension_semantics<parallel>, #tpu.dimension_semantics<parallel>, #tpu.dimension_semantics<arbitrary>], iteration_bounds = array<i64: 1, 1, 1>, scalar_prefetch = 0 : i64, scratch_operands = 1 : i64, tpu.core_type = #tpu.core_type<tc>, window_params = [{transform_indices = @transform_0, window_bounds = array<i64: 32, 128>}, {pipeline_mode = #tpu.pipeline_mode<synchronous>, transform_indices = @transform_1, window_bounds = array<i64: 128, 128>}, {pipeline_mode = #tpu.pipeline_mode<synchronous>, transform_indices = @transform_2, window_bounds = array<i64: 1, 128>}, {pipeline_mode = #tpu.pipeline_mode<synchronous>, transform_indices = @transform_3, window_bounds = array<i64: 1, 128>}, {pipeline_mode = #tpu.pipeline_mode<synchronous>, transform_indices = @transform_4, window_bounds = array<i64: 1, 128>}, {transform_indices = @transform_5, window_bounds = array<i64: 128, 512>}, {transform_indices = @transform_6, window_bounds = array<i64: 1, 512>}, {transform_indices = @transform_7, window_bounds = array<i64: 32, 512>}]} {
    %c0_i32 = arith.constant 0 : i32
    %0 = arith.cmpi eq, %arg2, %c0_i32 : i32
    %1 = arith.extui %0 : i1 to i32
    %c0_i32_0 = arith.constant 0 : i32
    %2 = arith.cmpi ne, %1, %c0_i32_0 : i32
    scf.if %2 {
      %c0_8 = arith.constant 0 : index
      %c0_9 = arith.constant 0 : index
      %10 = vector.load %arg3[%c0_8, %c0_9] : memref<32x128xbf16, #tpu.memory_space<vmem>>, vector<32x128xbf16>
      %c0_10 = arith.constant 0 : index
      %c0_11 = arith.constant 0 : index
      %11 = vector.load %arg4[%c0_10, %c0_11] : memref<128x128xbf16, #tpu.memory_space<vmem>>, vector<128x128xbf16>
      %c0_12 = arith.constant 0 : index
      %c0_13 = arith.constant 0 : index
      %12 = vector.load %arg5[%c0_12, %c0_13] : memref<1x128xf32, #tpu.memory_space<vmem>>, vector<1x128xf32>
      %c0_14 = arith.constant 0 : index
      %c0_15 = arith.constant 0 : index
      %13 = vector.load %arg6[%c0_14, %c0_15] : memref<1x128xf32, #tpu.memory_space<vmem>>, vector<1x128xf32>
      %c0_16 = arith.constant 0 : index
      %c0_17 = arith.constant 0 : index
      %14 = vector.load %arg7[%c0_16, %c0_17] : memref<1x128xf32, #tpu.memory_space<vmem>>, vector<1x128xf32>
      %cst_18 = arith.constant dense<0.000000e+00> : vector<32x128xf32>
      %15 = tpu.matmul %10, %11, %cst_18 {dimension_numbers = #tpu.dot_dimension_numbers<[1], [0], [0], [1], [0, 0, 1, 1], [], []>} : vector<32x128xbf16>, vector<128x128xbf16>, vector<32x128xf32> -> vector<32x128xf32>
      %16 = vector.broadcast %12 : vector<1x128xf32> to vector<32x128xf32>
      %17 = arith.addf %15, %16 : vector<32x128xf32>
      %cst_19 = arith.constant 5.000000e-01 : f32
      %18 = vector.broadcast %cst_19 : f32 to vector<32x128xf32>
      %19 = arith.mulf %18, %17 : vector<32x128xf32>
      %cst_20 = arith.constant 4.471500e-02 : f32
      %20 = vector.broadcast %cst_20 : f32 to vector<32x128xf32>
      %21 = arith.mulf %20, %17 : vector<32x128xf32>
      %22 = arith.mulf %21, %17 : vector<32x128xf32>
      %23 = arith.mulf %22, %17 : vector<32x128xf32>
      %24 = arith.addf %17, %23 : vector<32x128xf32>
      %cst_21 = arith.constant 0.797884583 : f32
      %25 = vector.broadcast %cst_21 : f32 to vector<32x128xf32>
      %26 = arith.mulf %25, %24 : vector<32x128xf32>
      %27 = math.tanh %26 : vector<32x128xf32>
      %cst_22 = arith.constant 1.000000e+00 : f32
      %28 = vector.broadcast %cst_22 : f32 to vector<32x128xf32>
      %29 = arith.addf %28, %27 : vector<32x128xf32>
      %30 = arith.mulf %19, %29 : vector<32x128xf32>
      %cst_23 = arith.constant dense<0.000000e+00> : vector<32xf32>
      %31 = vector.multi_reduction <add>, %30, %cst_23 [1] : vector<32x128xf32> to vector<32xf32>
      %32 = vector.shape_cast %31 : vector<32xf32> to vector<32x1xf32>
      %cst_24 = arith.constant 1.280000e+02 : f32
      %33 = vector.broadcast %cst_24 : f32 to vector<32x1xf32>
      %34 = arith.divf %32, %33 : vector<32x1xf32>
      %35 = vector.broadcast %34 : vector<32x1xf32> to vector<32x128xf32>
      %36 = arith.subf %30, %35 : vector<32x128xf32>
      %37 = arith.mulf %36, %36 : vector<32x128xf32>
      %cst_25 = arith.constant dense<0.000000e+00> : vector<32xf32>
      %38 = vector.multi_reduction <add>, %37, %cst_25 [1] : vector<32x128xf32> to vector<32xf32>
      %39 = vector.shape_cast %38 : vector<32xf32> to vector<32x1xf32>
      %cst_26 = arith.constant 1.280000e+02 : f32
      %40 = vector.broadcast %cst_26 : f32 to vector<32x1xf32>
      %41 = arith.divf %39, %40 : vector<32x1xf32>
      %42 = vector.broadcast %34 : vector<32x1xf32> to vector<32x128xf32>
      %43 = arith.subf %30, %42 : vector<32x128xf32>
      %cst_27 = arith.constant 9.99999996E-13 : f32
      %44 = vector.broadcast %cst_27 : f32 to vector<32x1xf32>
      %45 = arith.addf %41, %44 : vector<32x1xf32>
      %46 = math.rsqrt %45 : vector<32x1xf32>
      %47 = vector.broadcast %46 : vector<32x1xf32> to vector<32x128xf32>
      %48 = arith.mulf %43, %47 : vector<32x128xf32>
      %49 = vector.broadcast %13 : vector<1x128xf32> to vector<32x128xf32>
      %50 = arith.mulf %48, %49 : vector<32x128xf32>
      %51 = vector.broadcast %14 : vector<1x128xf32> to vector<32x128xf32>
      %52 = arith.addf %50, %51 : vector<32x128xf32>
      %53 = arith.truncf %52 : vector<32x128xf32> to vector<32x128xbf16>
      %c0_28 = arith.constant 0 : index
      %c0_29 = arith.constant 0 : index
      %54 = vector.load %arg11[%c0_28, %c0_29] : memref<32x128xbf16, #tpu.memory_space<vmem>>, vector<32x128xbf16>
      tpu.vector_store %arg11[%c0_28, %c0_29], %53 {strides = array<i32>} : memref<32x128xbf16, #tpu.memory_space<vmem>>, vector<32x128xbf16>,
    } else {
    }
    %c0 = arith.constant 0 : index
    %c0_1 = arith.constant 0 : index
    %3 = vector.load %arg11[%c0, %c0_1] : memref<32x128xbf16, #tpu.memory_space<vmem>>, vector<32x128xbf16>
    %c0_2 = arith.constant 0 : index
    %c0_3 = arith.constant 0 : index
    %4 = vector.load %arg8[%c0_2, %c0_3] : memref<128x512xbf16, #tpu.memory_space<vmem>>, vector<128x512xbf16>
    %cst = arith.constant dense<0.000000e+00> : vector<32x512xf32>
    %5 = tpu.matmul %3, %4, %cst {dimension_numbers = #tpu.dot_dimension_numbers<[1], [0], [0], [1], [0, 0, 1, 1], [], []>} : vector<32x128xbf16>, vector<128x512xbf16>, vector<32x512xf32> -> vector<32x512xf32>
    %c0_4 = arith.constant 0 : index
    %c0_5 = arith.constant 0 : index
    %6 = vector.load %arg9[%c0_4, %c0_5] : memref<1x512xf32, #tpu.memory_space<vmem>>, vector<1x512xf32>
    %7 = vector.broadcast %6 : vector<1x512xf32> to vector<32x512xf32>
    %8 = arith.addf %5, %7 : vector<32x512xf32>
    %c0_6 = arith.constant 0 : index
    %c0_7 = arith.constant 0 : index
    %9 = vector.load %arg10[%c0_6, %c0_7] : memref<32x512xf32, #tpu.memory_space<vmem>>, vector<32x512xf32>
    tpu.vector_store %arg10[%c0_6, %c0_7], %8 {strides = array<i32>} : memref<32x512xf32, #tpu.memory_space<vmem>>, vector<32x512xf32>,
    return
  }
  func.func @transform_0(%arg0: i32, %arg1: i32, %arg2: i32) -> (i32, i32) {
    %c0_i32 = arith.constant 0 : i32
    %c0_i32_0 = arith.constant 0 : i32
    return %arg0, %c0_i32 : i32, i32
  }
  func.func @transform_1(%arg0: i32, %arg1: i32, %arg2: i32) -> (i32, i32) {
    %c0_i32 = arith.constant 0 : i32
    %c0_i32_0 = arith.constant 0 : i32
    %c0_i32_1 = arith.constant 0 : i32
    return %c0_i32, %c0_i32_0 : i32, i32
  }
  func.func @transform_2(%arg0: i32, %arg1: i32, %arg2: i32) -> (i32, i32) {
    %c0_i32 = arith.constant 0 : i32
    %c0_i32_0 = arith.constant 0 : i32
    %c0_i32_1 = arith.constant 0 : i32
    return %c0_i32, %c0_i32_0 : i32, i32
  }
  func.func @transform_3(%arg0: i32, %arg1: i32, %arg2: i32) -> (i32, i32) {
    %c0_i32 = arith.constant 0 : i32
    %c0_i32_0 = arith.constant 0 : i32
    %c0_i32_1 = arith.constant 0 : i32
    return %c0_i32, %c0_i32_0 : i32, i32
  }
  func.func @transform_4(%arg0: i32, %arg1: i32, %arg2: i32) -> (i32, i32) {
    %c0_i32 = arith.constant 0 : i32
    %c0_i32_0 = arith.constant 0 : i32
    %c0_i32_1 = arith.constant 0 : i32
    return %c0_i32, %c0_i32_0 : i32, i32
  }
  func.func @transform_5(%arg0: i32, %arg1: i32, %arg2: i32) -> (i32, i32) {
    %c1_i32 = arith.constant 1 : i32
    %0 = arith.muli %arg1, %c1_i32 : i32
    %1 = arith.addi %0, %arg2 : i32
    %c0_i32 = arith.constant 0 : i32
    %c0_i32_0 = arith.constant 0 : i32
    return %c0_i32, %1 : i32, i32
  }
  func.func @transform_6(%arg0: i32, %arg1: i32, %arg2: i32) -> (i32, i32) {
    %c1_i32 = arith.constant 1 : i32
    %0 = arith.muli %arg1, %c1_i32 : i32
    %1 = arith.addi %0, %arg2 : i32
    %c0_i32 = arith.constant 0 : i32
    %c0_i32_0 = arith.constant 0 : i32
    return %c0_i32, %1 : i32, i32
  }
  func.func @transform_7(%arg0: i32, %arg1: i32, %arg2: i32) -> (i32, i32) {
    %c1_i32 = arith.constant 1 : i32
    %0 = arith.muli %arg1, %c1_i32 : i32
    %1 = arith.addi %0, %arg2 : i32
    %c0_i32 = arith.constant 0 : i32
    return %arg0, %1 : i32, i32
  }
}

</mosaic_0001>

<bundles_post_ra>
// kernel: tpu_custom_call.1
= control target key start
LH: loop header
LB: loop body
LE: loop exit
PB: predicated region body
PF: predicated region fallthrough
CT: control target
= control target key end

     0   :  { %12 = vsyncpa [#allocation4], 0  ;;  %s1174_s0 = inlined_call_operand.hbm [shape: bf16[32,128], index: 0, kind: input, shape index: {}]   ;;  %s1175_s1 = inlined_call_operand.hbm [shape: bf16[128,128], index: 1, kind: input, shape index: {}]   ;;  %s1176_s2 = inlined_call_operand.vmem [shape: f32[1,128], index: 2, kind: input, shape index: {}]   ;;  %s1177_s3 = inlined_call_operand.vmem [shape: f32[1,128], index: 3, kind: input, shape index: {}]   ;;  %s1178_s4 = inlined_call_operand.vmem [shape: f32[1,128], index: 4, kind: input, shape index: {}]   ;;  %s1179_s5 = inlined_call_operand.hbm [shape: bf16[128,512], index: 5, kind: input, shape index: {}]   ;;  %s1180_s6 = inlined_call_operand.vmem [shape: f32[1,512], index: 6, kind: input, shape index: {}]   ;;  %s1181_s7 = inlined_call_operand.hbm [shape: f32[32,512], index: 7, kind: output, shape index: {}]  }
   0x1   :  { %13 = vsyncpa [#allocation7], 0 }
   0x2   :  { %14 = vsyncpa [#allocation5], 0  ;;  %s976_s24 = smov [#allocation6]   ;;  %s977_s26 = smov [#allocation3]  }
   0x3   :  { %s32_s25 = sshll.u32 %s976_s24, 4  ;;  %s20_s27 = sshll.u32 %s977_s26, 4  ;;  %s33_s25 = int_to_ptr.vmem [resolvable:$true] %s32_s25  ;;  %s1027_s27 = int_to_ptr.vmem [resolvable:$true] %s20_s27 }
   0x4   :  { %s882_s30 = scalar_lea.hbm %s1175_s1, 1024 }
   0x5   :  { %p883_p0 = scmp.ne.s32.totalorder %s1175_s1, %s882_s30  ;;  %p886_p1 = scmp.lt.u32.totalorder %s882_s30, %s1175_s1 }
   0x7   :  { %p888_p2 = pnand %p886_p1, %p883_p0 }
   0x9   :  { %891 = shalt.err (!%p888_p2)
}
   0xa   :  { %s892_s12 = scalar_lea.vmem %s33_s25, 1024  ;;  %p897_p4 = scmp.lt.s32.totalorder %s33_s25, %s33_s25 }
   0xb   :  { %p893_p3 = scmp.ne.s32.totalorder %s33_s25, %s892_s12  ;;  %p898_p5 = scmp.lt.s32.totalorder %s892_s12, %s892_s12 }
   0xd   :  { %p899_p6 = por %p898_p5, %p897_p4 }
   0xf   :  { %p900_p7 = pnand %p899_p6, %p893_p3 }
  0x11   :  { %903 = shalt.err (!%p900_p7)
}
  0x12   :  { %s978_s13 = smov 64   ;;  %s979_s14 = smov 4  }
  0x13   :  { %38 = dma.hbm_to_vmem [thread:$0]  %s1175_s1, 1024, %s33_s25, [#allocation7], %s978_s13, %s978_s13, %s979_s14  }
  0x14   :  { %s904_s19 = scalar_lea.hbm %s1174_s0, 256 }
  0x15   :  { %p905_p8 = scmp.ne.s32.totalorder %s1174_s0, %s904_s19  ;;  %p908_p9 = scmp.lt.u32.totalorder %s904_s19, %s1174_s0 }
  0x17   :  { %p910_p10 = pnand %p908_p9, %p905_p8 }
  0x19   :  { %913 = shalt.err (!%p910_p10)
}
  0x1a   :  { %s914_s24 = scalar_lea.vmem %s1027_s27, 256  ;;  %p919_p12 = scmp.lt.s32.totalorder %s1027_s27, %s1027_s27 }
  0x1b   :  { %p915_p11 = scmp.ne.s32.totalorder %s1027_s27, %s914_s24  ;;  %p920_p13 = scmp.lt.s32.totalorder %s914_s24, %s914_s24 }
  0x1d   :  { %p921_p0 = por %p920_p13, %p919_p12 }
  0x1f   :  { %p922_p1 = pnand %p921_p0, %p915_p11 }
  0x21   :  { %925 = shalt.err (!%p922_p1)
}
  0x22   :  { %26 = dma.hbm_to_vmem [thread:$0]  %s1174_s0, 256, %s1027_s27, [#allocation4], %s978_s13, %s978_s13, %s979_s14  }
  0x23   :  { %s980_s26 = smov [#allocation8]   ;;  %s926_s8 = scalar_lea.hbm %s1179_s5, 4096 }
  0x24   :  { %s54_s28 = sshll.u32 %s980_s26, 4  ;;  %p927_p2 = scmp.ne.s32.totalorder %s1179_s5, %s926_s8  ;;  %s55_s28 = int_to_ptr.vmem [resolvable:$true] %s54_s28 }
  0x25   :  { %p930_p3 = scmp.lt.u32.totalorder %s926_s8, %s1179_s5 }
  0x27   :  { %p932_p4 = pnand %p930_p3, %p927_p2 }
  0x29   :  { %935 = shalt.err (!%p932_p4)
}
  0x2a   :  { %s936_s15 = scalar_lea.vmem %s55_s28, 4096  ;;  %p941_p6 = scmp.lt.s32.totalorder %s55_s28, %s55_s28 }
  0x2b   :  { %p937_p5 = scmp.ne.s32.totalorder %s55_s28, %s936_s15  ;;  %p942_p7 = scmp.lt.s32.totalorder %s936_s15, %s936_s15 }
  0x2d   :  { %p943_p8 = por %p942_p7, %p941_p6 }
  0x2f   :  { %p944_p9 = pnand %p943_p8, %p937_p5 }
  0x31   :  { %947 = shalt.err (!%p944_p9)
}
  0x32   :  { %s981_s0 = smov 256   ;;  %s982_s27 = smov 16  }
  0x33   :  { %60 = dma.hbm_to_vmem [thread:$0]  %s1179_s5, 4096, %s55_s28, [#allocation7], %s981_s0, %s981_s0, %s982_s27  }
  0x34   :  { %970 = dma.done.wait [#allocation4], 256  }
  0x35   :  { %971 = vsyncadd [#allocation4], 4294967040 }
  0x36   :  { %972 = dma.done.wait [#allocation7], 5120  }
  0x37   :  { %973 = vsyncadd [#allocation7], 4294962176  ;;  %v808_v0 = vld [vmem:[#allocation6] sm:$0xff]   ;;  %v809_v1 = vld [vmem:[#allocation6 + $0x8] sm:$0xff]  }
  0x38   :  { %761 = vmatprep.subr.bf16.mxu0 %v808_v0  ;;  %v810_v2 = vld [vmem:[#allocation6 + $0x10] sm:$0xff]   ;;  %v811_v3 = vld [vmem:[#allocation6 + $0x18] sm:$0xff]   ;;  %v812_v5 = vld [vmem:[#allocation6 + $0x20] sm:$0xff]  }
  0x39   :  { %762 = vmatpush3.bf16.msra.mxu0 %v808_v0  ;;  %v816_v4 = vld [vmem:[#allocation3] sm:$0xff]   ;;  %v813_v6 = vld [vmem:[#allocation6 + $0x28] sm:$0xff]   ;;  %v815_v8 = vld [vmem:[#allocation6 + $0x38] sm:$0xff]  }
  0x3a   :  { %763 = vmatprep.subr.bf16.mxu0 %v809_v1  ;;  %777 = vmatprep.mubr.bf16.mxu0 %v816_v4  ;;  %v814_v7 = vld [vmem:[#allocation6 + $0x30] sm:$0xff]   ;;  %v817_v9 = vld [vmem:[#allocation3 + $0x8] sm:$0xff]  }
  0x3b   :  { %v706_v10 = vld [vmem:[%s1176_s2] ss:$0 sm:$0xff]  ;;  %v818_v55 = vld [vmem:[#allocation8 + $0x4] ss:$16 sps:$4 sm:$0xff]   ;;  %v1073_v57 = vld [vmem:[#allocation8 + $0x8] ss:$16 sps:$4 sm:$0xff]  }
  0x3c   :  { %v820_v56 = vld [vmem:[#allocation8] ss:$16 sps:$4 sm:$0xff]   ;;  %v1075_v58 = vld [vmem:[#allocation8 + $0xc] ss:$16 sps:$4 sm:$0xff]   ;;  %v824_v59 = vld [vmem:[#allocation8 + $0x24] ss:$16 sps:$4 sm:$0xff]   ;;  %559 = vmatprep.subr.bf16.mxu1 %v818_v55 }
  0x3d   :  { %764 = vmatpush3.bf16.msra.mxu0 %v809_v1  ;;  %v1077_v60 = vld [vmem:[#allocation8 + $0x2c] ss:$16 sps:$4 sm:$0xff]   ;;  %560 = vmatpush1.bf16.msra.mxu1 %v820_v56  ;;  %v826_v61 = vld [vmem:[#allocation8 + $0x20] ss:$16 sps:$4 sm:$0xff]   ;;  %v1081_v62 = vld [vmem:[#allocation8 + $0x28] ss:$16 sps:$4 sm:$0xff]  }
  0x3e   :  { %765 = vmatprep.subr.bf16.mxu0 %v810_v2  ;;  %561 = vmatprep.subr.bf16.mxu1 %v824_v59 }
  0x41   :  { %766 = vmatpush3.bf16.msra.mxu0 %v810_v2  ;;  %562 = vmatpush1.bf16.msra.mxu1 %v826_v61  ;;  %v718_v61 = vld [vmem:[%s1178_s4] ss:$0 sm:$0xff] }
  0x42   :  { %767 = vmatprep.subr.bf16.mxu0 %v811_v3 }
  0x45   :  { %768 = vmatpush3.bf16.msra.mxu0 %v811_v3 }
  0x46   :  { %769 = vmatprep.subr.bf16.mxu0 %v812_v5 }
  0x49   :  { %770 = vmatpush3.bf16.msra.mxu0 %v812_v5 }
  0x4a   :  { %771 = vmatprep.subr.bf16.mxu0 %v813_v6 }
  0x4d   :  { %772 = vmatpush3.bf16.msra.mxu0 %v813_v6 }
  0x4e   :  { %773 = vmatprep.subr.bf16.mxu0 %v814_v7 }
  0x51   :  { %774 = vmatpush3.bf16.msra.mxu0 %v814_v7 }
  0x52   :  { %775 = vmatprep.subr.bf16.mxu0 %v815_v8 }
  0x55   :  { %776 = vmatpush3.bf16.msra.mxu0 %v815_v8 }
  0x56   :  { %612 = vmatprep.subr.bf16.mxu0 %v1075_v58 }
  0x58   :  { %778 = vmatmul.mubr.bf16.vlgmr.msra.gmra.mrb[0].mxu0 %v817_v9 }
  0x59   :  { %613 = vmatpush1.bf16.msra.mxu0 %v1073_v57 }
  0x5a   :  { %614 = vmatprep.subr.bf16.mxu0 %v1077_v60 }
  0x5d   :  { %615 = vmatpush1.bf16.msra.mxu0 %v1081_v62 }
 0x12b   :  { %v779_v11 = vpop.f32.mrb[0].mxu0 }
 0x12c   :  { %v232_v12 = vadd.f32 %v779_v11, %v706_v10  ;;  %v223_v13 = vpop.f32.mrb[1].mxu0 }
 0x12d   :  { %v224_v14 = vadd.f32 %v706_v10, %v223_v13  ;;  %v780_v15 = vpop.f32.mrb[2].mxu0 }
 0x12e   :  { %v244_v16 = vmul.f32 0.044715, %v232_v12  ;;  %v235_v17 = vadd.f32 %v780_v15, %v706_v10  ;;  %v226_v18 = vpop.f32.mrb[3].mxu0  ;;  %v240_v41 = vmul.f32 0.5, %v232_v12  ;;  %v830_v15 = vld [vmem:[#allocation8 + $0x44] ss:$16 sps:$4 sm:$0xff]  }
 0x12f   :  { %v242_v19 = vmul.f32 0.044715, %v224_v14  ;;  %v227_v20 = vadd.f32 %v706_v10, %v226_v18  ;;  %v238_v44 = vmul.f32 0.5, %v224_v14  ;;  %563 = vmatprep.subr.bf16.mxu1 %v830_v15  ;;  %v1103_v18 = vld [vmem:[#allocation8 + $0x48] ss:$16 sps:$4 sm:$0xff]  }
 0x130   :  { %v245_v21 = vmul.f32 0.044715, %v235_v17  ;;  %v248_v22 = vmul.f32 %v244_v16, %v232_v12  ;;  %v241_v51 = vmul.f32 0.5, %v235_v17  ;;  %v832_v16 = vld [vmem:[#allocation8 + $0x40] ss:$16 sps:$4 sm:$0xff]  }
 0x131   :  { %v243_v23 = vmul.f32 0.044715, %v227_v20  ;;  %v246_v24 = vmul.f32 %v242_v19, %v224_v14  ;;  %v239_v52 = vmul.f32 0.5, %v227_v20  ;;  %564 = vmatpush1.bf16.msra.mxu1 %v832_v16  ;;  %v836_v19 = vld [vmem:[#allocation8 + $0x64] ss:$16 sps:$4 sm:$0xff]  }
 0x132   :  { %v252_v25 = vmul.f32 %v248_v22, %v232_v12  ;;  %v249_v26 = vmul.f32 %v245_v21, %v235_v17  ;;  %v1107_v21 = vld [vmem:[#allocation8 + $0x6c] ss:$16 sps:$4 sm:$0xff]   ;;  %565 = vmatprep.subr.bf16.mxu1 %v836_v19  ;;  %v1109_v22 = vld [vmem:[#allocation8 + $0x68] ss:$16 sps:$4 sm:$0xff]  }
 0x133   :  { %v250_v27 = vmul.f32 %v246_v24, %v224_v14  ;;  %v247_v28 = vmul.f32 %v243_v23, %v227_v20  ;;  %v842_v23 = vld [vmem:[#allocation8 + $0x84] ss:$16 sps:$4 sm:$0xff]   ;;  %v844_v24 = vld [vmem:[#allocation8 + $0x80] ss:$16 sps:$4 sm:$0xff]  }
 0x134   :  { %v256_v29 = vadd.f32 %v252_v25, %v232_v12  ;;  %v253_v30 = vmul.f32 %v249_v26, %v235_v17  ;;  %v1113_v25 = vld [vmem:[#allocation8 + $0x8c] ss:$16 sps:$4 sm:$0xff]   ;;  %v1115_v26 = vld [vmem:[#allocation8 + $0x88] ss:$16 sps:$4 sm:$0xff]  }
 0x135   :  { %v254_v31 = vadd.f32 %v250_v27, %v224_v14  ;;  %v251_v32 = vmul.f32 %v247_v28, %v227_v20  ;;  %v848_v27 = vld [vmem:[#allocation8 + $0xa4] ss:$16 sps:$4 sm:$0xff]   ;;  %v850_v28 = vld [vmem:[#allocation8 + $0xa0] ss:$16 sps:$4 sm:$0xff]  }
 0x136   :  { %v260_v33 = vmul.f32 0.7978846, %v256_v29  ;;  %v257_v34 = vadd.f32 %v253_v30, %v235_v17  ;;  %v1101_v17 = vld [vmem:[#allocation8 + $0x4c] ss:$16 sps:$4 sm:$0xff]   ;;  %v1119_v29 = vld [vmem:[#allocation8 + $0xa8] ss:$16 sps:$4 sm:$0xff]  }
 0x137   :  { %v258_v35 = vmul.f32 0.7978846, %v254_v31  ;;  %v255_v36 = vadd.f32 %v251_v32, %v227_v20  ;;  %616 = vmatprep.subr.bf16.mxu0 %v1101_v17  ;;  %v838_v20 = vld [vmem:[#allocation8 + $0x60] ss:$16 sps:$4 sm:$0xff]   ;;  %v1121_v30 = vld [vmem:[#allocation8 + $0xac] ss:$16 sps:$4 sm:$0xff]  }
 0x138   :  { %866 = vtanh.f32 %v260_v33  ;;  %v261_v37 = vmul.f32 0.7978846, %v257_v34  ;;  %617 = vmatpush1.bf16.msra.mxu0 %v1103_v18  ;;  %566 = vmatpush1.bf16.msra.mxu1 %v838_v20  ;;  %v854_v31 = vld [vmem:[#allocation8 + $0xc4] ss:$16 sps:$4 sm:$0xff]   ;;  %v1123_v32 = vld [vmem:[#allocation8 + $0xcc] ss:$16 sps:$4 sm:$0xff]  }
 0x139   :  { %868 = vtanh.f32 %v258_v35  ;;  %v259_v38 = vmul.f32 0.7978846, %v255_v36  ;;  %618 = vmatprep.subr.bf16.mxu0 %v1107_v21  ;;  %567 = vmatprep.subr.bf16.mxu1 %v842_v23  ;;  %v856_v33 = vld [vmem:[#allocation8 + $0xc0] ss:$16 sps:$4 sm:$0xff]   ;;  %v1127_v34 = vld [vmem:[#allocation8 + $0xc8] ss:$16 sps:$4 sm:$0xff]  }
 0x13a   :  { %870 = vtanh.f32 %v261_v37  ;;  %v860_v35 = vld [vmem:[#allocation8 + $0xe4] ss:$16 sps:$4 sm:$0xff]   ;;  %v1130_v36 = vld [vmem:[#allocation8 + $0xec] ss:$16 sps:$4 sm:$0xff]   ;;  %v983_v37 = vmov 0  }
 0x13b   :  { %872 = vtanh.f32 %v259_v38  ;;  %591 = vmatprep.mubr.bf16.mxu1 %v983_v37  ;;  %644 = vmatprep.mubr.bf16.mxu0 %v983_v37  ;;  %v862_v38 = vld [vmem:[#allocation8 + $0xe0] ss:$16 sps:$4 sm:$0xff]  }
 0x13c   :  { %619 = vmatpush1.bf16.msra.mxu0 %v1109_v22  ;;  %568 = vmatpush1.bf16.msra.mxu1 %v844_v24 }
 0x13d   :  { %620 = vmatprep.subr.bf16.mxu0 %v1113_v25  ;;  %569 = vmatprep.subr.bf16.mxu1 %v848_v27 }
 0x140   :  { %621 = vmatpush1.bf16.msra.mxu0 %v1115_v26  ;;  %570 = vmatpush1.bf16.msra.mxu1 %v850_v28 }
 0x141   :  { %622 = vmatprep.subr.bf16.mxu0 %v1121_v30  ;;  %571 = vmatprep.subr.bf16.mxu1 %v854_v31 }
 0x142   :  { %v867_v39 = vpop.eup %866 }
 0x143   :  { %v869_v40 = vpop.eup %868  ;;  %v268_v42 = vadd.f32 1.0, %v867_v39  ;;  %v863_v39 = vld [vmem:[#allocation8 + $0xe8] ss:$16 sps:$4 sm:$0xff]  }
 0x144   :  { %v871_v43 = vpop.eup %870  ;;  %v266_v45 = vadd.f32 1.0, %v869_v40  ;;  %623 = vmatpush1.bf16.msra.mxu0 %v1119_v29  ;;  %572 = vmatpush1.bf16.msra.mxu1 %v856_v33 }
 0x145   :  { %v873_v46 = vpop.eup %872  ;;  %v272_v47 = vmul.f32 %v268_v42, %v240_v41  ;;  %v269_v48 = vadd.f32 1.0, %v871_v43  ;;  %624 = vmatprep.subr.bf16.mxu0 %v1123_v32  ;;  %573 = vmatprep.subr.bf16.mxu1 %v860_v35 }
 0x146   :  { %v270_v49 = vmul.f32 %v266_v45, %v238_v44  ;;  %v267_v50 = vadd.f32 1.0, %v873_v46 }
 0x147   :  { %278 = vadd.xlane.f32.xlu1 %v272_v47  ;;  %v273_v53 = vmul.f32 %v269_v48, %v241_v51 }
 0x148   :  { %274 = vadd.xlane.f32.xlu0 %v270_v49  ;;  %v271_v54 = vmul.f32 %v267_v50, %v239_v52  ;;  %625 = vmatpush1.bf16.msra.mxu0 %v1127_v34 }
 0x149   :  { %626 = vmatprep.subr.bf16.mxu0 %v1130_v36  ;;  %574 = vmatpush1.bf16.msra.mxu1 %v862_v38 }
 0x14a   :  { %781 = vmatprep.subr.bf16.mxu1 %v1075_v58 }
 0x14b   :  { %280 = vadd.xlane.f32.xlu1 %v273_v53 }
 0x14c   :  { %276 = vadd.xlane.f32.xlu0 %v271_v54  ;;  %627 = vmatpush1.bf16.msra.mxu0 %v863_v39 }
 0x1d4   :  { %v279_v63 = vpop.xlane.xlu1 %278 }
 0x1d5   :  { %v275_v0 = vpop.xlane.xlu0 %274  ;;  %v285_v1 = vmul.f32 0.0078125, %v279_v63 }
 0x1d6   :  { %v283_v2 = vmul.f32 0.0078125, %v275_v0 }
 0x1d7   :  { %v1087_v6 = vsub.f32 %v272_v47, %v285_v1 }
 0x1d8   :  { %v1085_v3 = vsub.f32 %v270_v49, %v283_v2  ;;  %v281_v4 = vpop.xlane.xlu1 %280 }
 0x1d9   :  { %v277_v5 = vpop.xlane.xlu0 %276  ;;  %v286_v7 = vmul.f32 0.0078125, %v281_v4  ;;  %v293_v12 = vmul.f32 %v1087_v6, %v1087_v6 }
 0x1da   :  { %v284_v8 = vmul.f32 0.0078125, %v277_v5  ;;  %v291_v9 = vmul.f32 %v1085_v3, %v1085_v3 }
 0x1db   :  { %v1093_v11 = vsub.f32 %v273_v53, %v286_v7 }
 0x1dc   :  { %v1091_v10 = vsub.f32 %v271_v54, %v284_v8  ;;  %295 = vadd.xlane.f32.xlu0 %v291_v9  ;;  %v717_v54 = vld [vmem:[%s1177_s3] ss:$0 sm:$0xff] }
 0x1dd   :  { %v294_v14 = vmul.f32 %v1093_v11, %v1093_v11 }
 0x1de   :  { %v292_v13 = vmul.f32 %v1091_v10, %v1091_v10 }
 0x1e0   :  { %299 = vadd.xlane.f32.xlu0 %v293_v12  ;;  %297 = vadd.xlane.f32.xlu1 %v292_v13 }
 0x1e4   :  { %301 = vadd.xlane.f32.xlu1 %v294_v14 }
 0x269   :  { %v296_v40 = vpop.xlane.xlu0 %295 }
 0x26a   :  { %v303_v41 = vmul.f32 0.0078125, %v296_v40 }
 0x26c   :  { %v307_v42 = vadd.f32 1e-12, %v303_v41 }
 0x26d   :  { %v298_v43 = vpop.xlane.xlu1 %297  ;;  %v300_v44 = vpop.xlane.xlu0 %299 }
 0x26e   :  { %874 = vrsqrt.f32 %v307_v42  ;;  %v304_v45 = vmul.f32 0.0078125, %v298_v43  ;;  %v305_v46 = vmul.f32 0.0078125, %v300_v44 }
 0x270   :  { %v308_v47 = vadd.f32 1e-12, %v304_v45  ;;  %v309_v48 = vadd.f32 1e-12, %v305_v46 }
 0x271   :  { %v302_v49 = vpop.xlane.xlu1 %301 }
 0x272   :  { %876 = vrsqrt.f32 %v308_v47  ;;  %v306_v50 = vmul.f32 0.0078125, %v302_v49 }
 0x273   :  { %878 = vrsqrt.f32 %v309_v48 }
 0x274   :  { %v310_v51 = vadd.f32 1e-12, %v306_v50 }
 0x276   :  { %880 = vrsqrt.f32 %v310_v51 }
 0x278   :  { %v875_v52 = vpop.eup %874 }
 0x279   :  { %v315_v53 = vmul.f32 %v875_v52, %v1085_v3 }
 0x27b   :  { %v325_v58 = vmul.f32 %v717_v54, %v315_v53 }
 0x27c   :  { %v877_v55 = vpop.eup %876 }
 0x27d   :  { %v316_v56 = vmul.f32 %v877_v55, %v1091_v10  ;;  %v879_v59 = vpop.eup %878  ;;  %v335_v1 = vadd.f32 %v718_v61, %v325_v58 }
 0x27e   :  { %v317_v4 = vmul.f32 %v879_v59, %v1087_v6 }
 0x27f   :  { %v326_v63 = vmul.f32 %v717_v54, %v316_v56 }
 0x280   :  { %v881_v0 = vpop.eup %880  ;;  %v327_v8 = vmul.f32 %v717_v54, %v317_v4 }
 0x281   :  { %v336_v2 = vadd.f32 %v718_v61, %v326_v63  ;;  %v318_v3 = vmul.f32 %v881_v0, %v1093_v11  ;;  %v377_v11 = vld [vmem:[%s1180_s6] sm:$0xf]  ;;  %s984_s6 = smov [#allocation9]  }
 0x282   :  { %v337_v10 = vadd.f32 %v718_v61, %v327_v8  ;;  %s690_s20 = sshll.u32 %s984_s6, 4  ;;  %s691_s20 = int_to_ptr.vmem [resolvable:$true] %s690_s20 }
 0x283   :  { %v339_v5 = vpack.c.bf16 %v336_v2, %v335_v1  ;;  %v328_v7 = vmul.f32 %v717_v54, %v318_v3  ;;  %s948_s21 = scalar_lea.vmem %s691_s20, 2048  ;;  %p953_p11 = scmp.lt.s32.totalorder %s691_s20, %s691_s20 }
 0x284   :  { %p949_p10 = scmp.ne.s32.totalorder %s691_s20, %s948_s21  ;;  %p954_p12 = scmp.lt.s32.totalorder %s948_s21, %s948_s21 }
 0x285   :  { %592 = vmatmul.mubr.bf16.vlgmr.msra.gmra.mrb[0].mxu1 %v339_v5  ;;  %645 = vmatmul.mubr.bf16.vlgmr.msra.gmra.mrb[4].mxu0 %v339_v5  ;;  %v338_v9 = vadd.f32 %v718_v61, %v328_v7 }
 0x286   :  { %789 = vmatpush1.bf16.msra.mxu1 %v1073_v57  ;;  %601 = vmatprep.mubr.bf16.mxu1 %v983_v37  ;;  %v379_v57 = vlaneseq  ;;  %p955_p13 = por %p954_p12, %p953_p11 }
 0x287   :  { %782 = vmatprep.subr.bf16.mxu1 %v1077_v60  ;;  %v340_v12 = vpack.c.bf16 %v338_v9, %v337_v10 }
 0x288   :  { %v380_v60 = vshrl.u32 %v379_v57, 7  ;;  %p956_p0 = pnand %p955_p13, %p949_p10 }
 0x28a   :  { %790 = vmatpush1.bf16.msra.mxu1 %v1081_v62  ;;  %v381_v62 = vsub.s32 0, %v380_v60  ;;  %v389_v6 = vsub.s32 2, %v380_v60  ;;  %v385_v13 = vsub.s32 1, %v380_v60  ;;  %v393_v14 = vsub.s32 3, %v380_v60 }
 0x28b   :  { %783 = vmatprep.subr.bf16.mxu1 %v1101_v17 }
 0x28c   :  { %v382_v15 = vrot.slane %v377_v11, %v381_v62  ;;  %v390_v16 = vrot.slane %v377_v11, %v389_v6  ;;  %v386_v17 = vrot.slane %v377_v11, %v385_v13 }
 0x28d   :  { %602 = vmatmul.mubr.bf16.gmra.mrb[4].mxu1 %v340_v12 }
 0x28e   :  { %791 = vmatpush1.bf16.msra.mxu1 %v1103_v18  ;;  %654 = vmatprep.mubr.bf16.mxu1 %v983_v37  ;;  %v394_v18 = vrot.slane %v377_v11, %v393_v14 }
 0x28f   :  { %784 = vmatprep.subr.bf16.mxu1 %v1107_v21 }
 0x292   :  { %792 = vmatpush1.bf16.msra.mxu1 %v1109_v22 }
 0x293   :  { %785 = vmatprep.subr.bf16.mxu1 %v1113_v25 }
 0x296   :  { %793 = vmatpush1.bf16.msra.mxu1 %v1115_v26 }
 0x297   :  { %786 = vmatprep.subr.bf16.mxu1 %v1121_v30 }
 0x29a   :  { %794 = vmatpush1.bf16.msra.mxu1 %v1119_v29 }
 0x29b   :  { %787 = vmatprep.subr.bf16.mxu1 %v1123_v32 }
 0x29e   :  { %795 = vmatpush1.bf16.msra.mxu1 %v1127_v34 }
 0x29f   :  { %788 = vmatprep.subr.bf16.mxu1 %v1130_v36 }
 0x2a2   :  { %796 = vmatpush1.bf16.msra.mxu1 %v863_v39 }
 0x2a5   :  { %655 = vmatmul.mubr.bf16.vlgmr.msra.gmra.mrb[8].mxu1 %v340_v12 }
 0x358   :  { %v593_v19 = vpop.f32.mrb[0].mxu1  ;;  %v646_v20 = vpop.f32.mrb[4].mxu0 }
 0x359   :  { %v594_v21 = vadd.f32 %v593_v19, %v382_v15  ;;  %v647_v22 = vadd.f32 %v646_v20, %v390_v16  ;;  %v595_v23 = vpop.f32.mrb[1].mxu1  ;;  %v648_v24 = vpop.f32.mrb[5].mxu0 }
 0x35a   :  { %v596_v25 = vadd.f32 %v595_v23, %v386_v17  ;;  %v649_v26 = vadd.f32 %v648_v24, %v394_v18  ;;  %v597_v27 = vpop.f32.mrb[2].mxu1  ;;  %v650_v28 = vpop.f32.mrb[6].mxu0 }
 0x35b   :  { %665 = vst [vmem:[#allocation9] sm:$0xff] %v594_v21  ;;  %667 = vst [vmem:[#allocation9 + $0x10] sm:$0xff] %v647_v22  ;;  %v598_v29 = vadd.f32 %v597_v27, %v382_v15  ;;  %v651_v30 = vadd.f32 %v650_v28, %v390_v16  ;;  %v599_v31 = vpop.f32.mrb[3].mxu1  ;;  %v652_v32 = vpop.f32.mrb[7].mxu0 }
 0x35c   :  { %666 = vst [vmem:[#allocation9 + $0x8] sm:$0xff] %v596_v25  ;;  %668 = vst [vmem:[#allocation9 + $0x18] sm:$0xff] %v649_v26  ;;  %v600_v33 = vadd.f32 %v599_v31, %v386_v17  ;;  %v653_v34 = vadd.f32 %v652_v32, %v394_v18 }
 0x35d   :  { %669 = vst [vmem:[#allocation9 + $0x20] sm:$0xff] %v598_v29  ;;  %671 = vst [vmem:[#allocation9 + $0x30] sm:$0xff] %v651_v30 }
 0x35e   :  { %670 = vst [vmem:[#allocation9 + $0x28] sm:$0xff] %v600_v33  ;;  %672 = vst [vmem:[#allocation9 + $0x38] sm:$0xff] %v653_v34 }
 0x360   :  { %v603_v35 = vpop.f32.mrb[4].mxu1 }
 0x361   :  { %v604_v36 = vadd.f32 %v603_v35, %v382_v15  ;;  %v605_v37 = vpop.f32.mrb[5].mxu1 }
 0x362   :  { %v606_v38 = vadd.f32 %v605_v37, %v386_v17  ;;  %v607_v39 = vpop.f32.mrb[6].mxu1 }
 0x363   :  { %673 = vst [vmem:[#allocation9 + $0x40] sm:$0xff] %v604_v36  ;;  %v608_v40 = vadd.f32 %v607_v39, %v382_v15  ;;  %v609_v41 = vpop.f32.mrb[7].mxu1 }
 0x364   :  { %674 = vst [vmem:[#allocation9 + $0x48] sm:$0xff] %v606_v38  ;;  %v610_v42 = vadd.f32 %v609_v41, %v386_v17 }
 0x365   :  { %677 = vst [vmem:[#allocation9 + $0x60] sm:$0xff] %v608_v40 }
 0x366   :  { %678 = vst [vmem:[#allocation9 + $0x68] sm:$0xff] %v610_v42 }
 0x378   :  { %v656_v43 = vpop.f32.mrb[8].mxu1 }
 0x379   :  { %v657_v44 = vadd.f32 %v656_v43, %v390_v16  ;;  %v658_v45 = vpop.f32.mrb[9].mxu1 }
 0x37a   :  { %v659_v46 = vadd.f32 %v658_v45, %v394_v18  ;;  %v660_v47 = vpop.f32.mrb[10].mxu1 }
 0x37b   :  { %675 = vst [vmem:[#allocation9 + $0x50] sm:$0xff] %v657_v44  ;;  %v661_v48 = vadd.f32 %v660_v47, %v390_v16  ;;  %v662_v49 = vpop.f32.mrb[11].mxu1 }
 0x37c   :  { %676 = vst [vmem:[#allocation9 + $0x58] sm:$0xff] %v659_v46  ;;  %v663_v50 = vadd.f32 %v662_v49, %v394_v18 }
 0x37d   :  { %679 = vst [vmem:[#allocation9 + $0x70] sm:$0xff] %v661_v48 }
 0x37e   :  { %680 = vst [vmem:[#allocation9 + $0x78] sm:$0xff] %v663_v50 }
 0x37f   :  { %959 = shalt.err (!%p956_p0)
}
 0x380   :  { %s960_s24 = scalar_lea.hbm %s1181_s7, 2048 }
 0x381   :  { %p961_p1 = scmp.ne.s32.totalorder %s1181_s7, %s960_s24  ;;  %p964_p2 = scmp.lt.u32.totalorder %s960_s24, %s1181_s7 }
 0x383   :  { %p966_p3 = pnand %p964_p2, %p961_p1 }
 0x385   :  { %969 = shalt.err (!%p966_p3)
}
 0x386   :  { %s985_s29 = smov 512   ;;  %s986_s30 = smov 32  }
 0x387   :  { %696 = dma.vmem_to_hbm [thread:$0]  %s691_s20, 2048, %s1181_s7, [#allocation5], %s985_s29, %s985_s29, %s986_s30  }
 0x388   :  { %974 = dma.done.wait [#allocation5], 2048  }
 0x389   :  { %975 = vsyncadd [#allocation5], 4294965248 }
 0x38a   :  { %700 = vsyncpa [#allocation4], 1 }
 0x38b   :  { %701 = vsyncpa [#allocation7], 1 }
 0x38c   :  { %702 = vsyncpa [#allocation5], 1 }

</bundles_post_ra>
